<compile_context>
chip_gen: v7x
topology: tpu7x:2x2x1
jax: 0.10.0
libtpu: 0.0.40
codegen_flags: <defaults>
</compile_context>

<pallas_src>
import jax
import jax.numpy as jnp
from jax import lax
from jax.experimental import pallas as pl
from jax.experimental.pallas import tpu as pltpu


_EPS_SQ = 1e-24   # (F.normalize eps=1e-12) ** 2, applied to the sum of squares
_LANE = 128
_SUBLANE = 8


def _round_up(x, m):
    return ((x + m - 1) // m) * m


def _sensing_kernel(sino_ref, kt_ref, out_ref):
    # sino_ref: (TB, 784)    f32 streamed batch tile
    # kt_ref:   (784, P_pad) f32 raw transposed kernel (zero-padded cols), resident
    # out_ref:  (TB, P_pad)  f32 lane-dense output tile
    kt = kt_ref[...]                                         # (784, P_pad)
    # F.normalize(kernel, dim=0): per-column (over patterns) L2 norm == per-row
    # norm of the transposed weight.  Zero-padded columns contribute nothing.
    ss = jnp.sum(kt * kt, axis=1, keepdims=True)             # (784, 1)  XLU (tiny)
    inv = lax.rsqrt(jnp.maximum(ss, _EPS_SQ))                 # (784, 1)  EUP
    kt_n = kt * inv                                           # (784, P_pad) VPU (tiny)
    # Canonical (M,K) @ (K,N) MXU contraction, f32 accumulation.
    out_ref[...] = lax.dot_general(
        sino_ref[...], kt_n,
        dimension_numbers=(((1,), (0,)), ((), ())),
        preferred_element_type=jnp.float32,
    ).astype(out_ref.dtype)


def sensing_net_forward(sinogram_3d_img, kernel_param, *, tile_b=2048):
    """sinogram_3d_img: any shape (B, ...) with prod(...) == 784.
    kernel_param: (pattern_num, 784) raw (un-normalized) learned kernel."""
    batch_size = sinogram_3d_img.shape[0]
    pattern_num, src_num = kernel_param.shape
    assert src_num == 28 * 28

    sino = jnp.reshape(sinogram_3d_img, (batch_size, src_num)).astype(jnp.float32)

    # One-time weight prep (50 KB): transpose to (784, P) and zero-pad P -> 128k.
    p_pad = _round_up(pattern_num, _LANE)
    kt = jnp.pad(kernel_param.astype(jnp.float32).T,
                 ((0, 0), (0, p_pad - pattern_num)))

    # Pad the batch only to the sublane multiple (8), NOT to a full tile.
    padded_b = _round_up(batch_size, _SUBLANE)
    if padded_b != batch_size:
        sino = jnp.pad(sino, ((0, padded_b - batch_size), (0, 0)))
    tb = min(_round_up(tile_b, _SUBLANE), padded_b)
    grid_b = pl.cdiv(padded_b, tb)        # ragged last block handled by Pallas

    out = pl.pallas_call(
        _sensing_kernel,
        out_shape=jax.ShapeDtypeStruct((padded_b, p_pad), jnp.float32),
        grid_spec=pl.GridSpec(
            grid=(grid_b,),
            in_specs=[
                pl.BlockSpec((tb, src_num), lambda i: (i, 0)),       # streamed
                pl.BlockSpec((src_num, p_pad), lambda i: (0, 0)),    # resident
            ],
            out_specs=pl.BlockSpec((tb, p_pad), lambda i: (i, 0)),
        ),
        compiler_params=pltpu.CompilerParams(
            dimension_semantics=("parallel",),
            # tb=2048 double-buffered f32 input stream (~15 MB) + outputs +
            # weight: above v5e's 16 MiB default scoped VMEM, comfortably under
            # every generation's physical VMEM (64 / 128 MiB).
            vmem_limit_bytes=48 << 20,
        ),
    )(sino, kt)

    return out[:batch_size, :pattern_num]


def init_sensing_kernel(key, pattern_num, src_num):
    # nn.init.xavier_normal_ on a (pattern_num, src_num) tensor:
    #   fan_in = src_num, fan_out = pattern_num, std = sqrt(2/(fan_in+fan_out))
    std = (2.0 / (pattern_num + src_num)) ** 0.5
    return std * jax.random.normal(key, (pattern_num, src_num), dtype=jnp.float32)


def reference_forward(sinogram_3d_img, kernel_param):
    # Pure-JAX reference mirroring the PyTorch code.
    b = sinogram_3d_img.shape[0]
    p = kernel_param.shape[0]
    sino = jnp.reshape(sinogram_3d_img, (b, 28, 28)).astype(jnp.float32)
    col_norm = jnp.maximum(
        jnp.sqrt(jnp.sum(kernel_param * kernel_param, axis=0, keepdims=True)), 1e-12
    )
    pattern = (kernel_param / col_norm).reshape(p, 28, 28)
    mult = sino[:, None, :, :] * pattern[None, :, :, :]
    return jnp.sum(mult.reshape(b, p, 28 * 28), axis=2)


if __name__ == "__main__":
    key = jax.random.PRNGKey(0)
    k_kernel, k_input = jax.random.split(key)

    pattern_num = 16
    src_num = 28 * 28          # 784: sinogram flattens to 28x28
    det_num = 28               # implied by the 28x28 reshape
    batch_size = 2

    kernel_param = init_sensing_kernel(k_kernel, pattern_num, src_num)
    # NCHW-style input: (batch, channel=1, 28, 28); total per-batch elems = 784.
    x = jax.random.normal(k_input, (batch_size, 1, 28, 28), dtype=jnp.float32)

    out = sensing_net_forward(x, kernel_param)
    out = jax.block_until_ready(out)

    ref = reference_forward(x, kernel_param)
    assert out.shape == (batch_size, pattern_num)
    assert jnp.allclose(out, ref, atol=1e-4, rtol=1e-4)

    print("KERNEL_OK")
</pallas_src>

<mosaic_0001>
module attributes {stable_mosaic.version = 11 : i64} {
  func.func @_sensing_kernel(%arg0: i32, %arg1: memref<8x784xf32, #tpu.memory_space<vmem>>, %arg2: memref<784x128xf32, #tpu.memory_space<vmem>>, %arg3: memref<8x128xf32, #tpu.memory_space<vmem>>) attributes {dimension_semantics = [#tpu.dimension_semantics<parallel>], iteration_bounds = array<i64: 1>, scalar_prefetch = 0 : i64, scratch_operands = 0 : i64, tpu.core_type = #tpu.core_type<tc>, window_params = [{transform_indices = @transform_0, window_bounds = array<i64: 8, 784>}, {pipeline_mode = #tpu.pipeline_mode<synchronous>, transform_indices = @transform_1, window_bounds = array<i64: 784, 128>}, {transform_indices = @transform_2, window_bounds = array<i64: 8, 128>}]} {
    %c0 = arith.constant 0 : index
    %c0_0 = arith.constant 0 : index
    %0 = vector.load %arg2[%c0, %c0_0] : memref<784x128xf32, #tpu.memory_space<vmem>>, vector<784x128xf32>
    %1 = arith.mulf %0, %0 : vector<784x128xf32>
    %cst = arith.constant dense<0.000000e+00> : vector<784xf32>
    %2 = vector.multi_reduction <add>, %1, %cst [1] : vector<784x128xf32> to vector<784xf32>
    %3 = vector.shape_cast %2 : vector<784xf32> to vector<784x1xf32>
    %cst_1 = arith.constant 1.000000e-24 : f32
    %4 = vector.broadcast %cst_1 : f32 to vector<784x1xf32>
    %5 = arith.maximumf %3, %4 : vector<784x1xf32>
    %6 = math.rsqrt %5 : vector<784x1xf32>
    %7 = vector.broadcast %6 : vector<784x1xf32> to vector<784x128xf32>
    %8 = arith.mulf %0, %7 : vector<784x128xf32>
    %c0_2 = arith.constant 0 : index
    %c0_3 = arith.constant 0 : index
    %9 = vector.load %arg1[%c0_2, %c0_3] : memref<8x784xf32, #tpu.memory_space<vmem>>, vector<8x784xf32>
    %cst_4 = arith.constant dense<0.000000e+00> : vector<8x128xf32>
    %10 = tpu.matmul %9, %8, %cst_4 {dimension_numbers = #tpu.dot_dimension_numbers<[1], [0], [0], [1], [0, 0, 1, 1], [], []>} : vector<8x784xf32>, vector<784x128xf32>, vector<8x128xf32> -> vector<8x128xf32>
    %c0_5 = arith.constant 0 : index
    %c0_6 = arith.constant 0 : index
    %11 = vector.load %arg3[%c0_5, %c0_6] : memref<8x128xf32, #tpu.memory_space<vmem>>, vector<8x128xf32>
    tpu.vector_store %arg3[%c0_5, %c0_6], %10 {strides = array<i32>} : memref<8x128xf32, #tpu.memory_space<vmem>>, vector<8x128xf32>,
    return
  }
  func.func @transform_0(%arg0: i32) -> (i32, i32) {
    %c0_i32 = arith.constant 0 : i32
    %c0_i32_0 = arith.constant 0 : i32
    return %arg0, %c0_i32 : i32, i32
  }
  func.func @transform_1(%arg0: i32) -> (i32, i32) {
    %c0_i32 = arith.constant 0 : i32
    %c0_i32_0 = arith.constant 0 : i32
    %c0_i32_1 = arith.constant 0 : i32
    return %c0_i32, %c0_i32_0 : i32, i32
  }
  func.func @transform_2(%arg0: i32) -> (i32, i32) {
    %c0_i32 = arith.constant 0 : i32
    %c0_i32_0 = arith.constant 0 : i32
    return %arg0, %c0_i32 : i32, i32
  }
}

</mosaic_0001>

<bundles_post_ra>
// kernel: tpu_custom_call.1
= control target key start
LH: loop header
LB: loop body
LE: loop exit
PB: predicated region body
PF: predicated region fallthrough
CT: control target
= control target key end

     0   :  { %7 = vsyncpa [#allocation3], 0  ;;  %s1963_s0 = inlined_call_operand.hbm [shape: f32[8,784], index: 0, kind: input, shape index: {}]   ;;  %s1964_s1 = inlined_call_operand.hbm [shape: f32[784,128], index: 1, kind: input, shape index: {}]   ;;  %s1965_s2 = inlined_call_operand.hbm [shape: f32[8,128], index: 2, kind: output, shape index: {}]  }
   0x1   :  { %8 = vsyncpa [#allocation6], 0 }
   0x2   :  { %9 = vsyncpa [#allocation4], 0  ;;  %s1552_s9 = smov [#allocation2]   ;;  %s1553_s11 = smov [#allocation5]  }
   0x3   :  { %s16_s10 = sshll.u32 %s1552_s9, 4  ;;  %s25_s12 = sshll.u32 %s1553_s11, 4  ;;  %s17_s10 = int_to_ptr.vmem [resolvable:$true] %s16_s10  ;;  %s1575_s12 = int_to_ptr.vmem [resolvable:$true] %s25_s12 }
   0x4   :  { %s1480_s15 = scalar_lea.hbm %s1963_s0, 896 }
   0x5   :  { %p1481_p0 = scmp.ne.s32.totalorder %s1963_s0, %s1480_s15  ;;  %p1484_p1 = scmp.lt.u32.totalorder %s1480_s15, %s1963_s0 }
   0x7   :  { %p1486_p2 = pnand %p1484_p1, %p1481_p0 }
   0x9   :  { %1489 = shalt.err (!%p1486_p2)
}
   0xa   :  { %s1490_s20 = scalar_lea.vmem %s17_s10, 896  ;;  %p1495_p4 = scmp.lt.s32.totalorder %s17_s10, %s17_s10 }
   0xb   :  { %p1491_p3 = scmp.ne.s32.totalorder %s17_s10, %s1490_s20  ;;  %p1496_p5 = scmp.lt.s32.totalorder %s1490_s20, %s1490_s20 }
   0xd   :  { %p1497_p6 = por %p1496_p5, %p1495_p4 }
   0xf   :  { %p1498_p7 = pnand %p1497_p6, %p1491_p3 }
  0x11   :  { %1501 = shalt.err (!%p1498_p7)
}
  0x12   :  { %19 = dma.hbm_to_vmem [thread:$0]  %s1963_s0, 896, %s17_s10, [#allocation3]  }
  0x13   :  { %s1502_s25 = scalar_lea.hbm %s1964_s1, 12544 }
  0x14   :  { %p1503_p8 = scmp.ne.s32.totalorder %s1964_s1, %s1502_s25  ;;  %p1506_p9 = scmp.lt.u32.totalorder %s1502_s25, %s1964_s1 }
  0x16   :  { %p1508_p10 = pnand %p1506_p9, %p1503_p8 }
  0x18   :  { %1511 = shalt.err (!%p1508_p10)
}
  0x19   :  { %s1512_s30 = scalar_lea.vmem %s1575_s12, 12544  ;;  %p1517_p12 = scmp.lt.s32.totalorder %s1575_s12, %s1575_s12 }
  0x1a   :  { %p1513_p11 = scmp.ne.s32.totalorder %s1575_s12, %s1512_s30  ;;  %p1518_p13 = scmp.lt.s32.totalorder %s1512_s30, %s1512_s30 }
  0x1c   :  { %p1519_p0 = por %p1518_p13, %p1517_p12 }
  0x1e   :  { %p1520_p1 = pnand %p1519_p0, %p1513_p11 }
  0x20   :  { %1523 = shalt.err (!%p1520_p1)
}
  0x21   :  { %s1554_s0 = smov 128   ;;  %s1555_s3 = smov 8  }
  0x22   :  { %31 = dma.hbm_to_vmem [thread:$0]  %s1964_s1, 12544, %s1575_s12, [#allocation6], %s1554_s0, %s1554_s0, %s1555_s3  }
  0x23   :  { %1546 = dma.done.wait [#allocation3], 896  }
  0x24   :  { %1547 = vsyncadd [#allocation3], 4294966400 }
  0x25   :  { %1548 = dma.done.wait [#allocation6], 12544  }
  0x26   :  { %1549 = vsyncadd [#allocation6], 4294954752  ;;  %v1606_v0 = vld [vmem:[#allocation5 + $0x80] sm:$0xff]  ;;  %v1610_v2 = vld [vmem:[#allocation5 + $0x88] sm:$0xff]  ;;  %vm1557_vm0 = vmmov 0   ;;  %vm731_vm1 = vcmask 130048  }
  0x27   :  { %v1608_v1 = vld [vmem:[#allocation5] sm:$0xff]  ;;  %v152_v3 = vmul.f32 %v1606_v0, %v1606_v0  ;;  %v1616_v5 = vld [vmem:[#allocation5 + $0x8] sm:$0xff]  ;;  %v153_v6 = vmul.f32 %v1610_v2, %v1610_v2  ;;  %v1622_v8 = vld [vmem:[#allocation5 + $0x90] sm:$0xff]  ;;  %s1559_s1 = smov [#allocation7]  }
  0x28   :  { %v136_v4 = vmul.f32 %v1608_v1, %v1608_v1  ;;  %v137_v7 = vmul.f32 %v1616_v5, %v1616_v5  ;;  %v1624_v9 = vld [vmem:[#allocation5 + $0x98] sm:$0xff]  ;;  %v154_v10 = vmul.f32 %v1622_v8, %v1622_v8  ;;  %v1630_v12 = vld [vmem:[#allocation5 + $0x10] sm:$0xff]  ;;  %v1638_v16 = vld [vmem:[#allocation5 + $0xa0] sm:$0xff]  ;;  %s1022_s6 = sshll.u32 %s1559_s1, 4  ;;  %s1023_s6 = int_to_ptr.vmem [resolvable:$true] %s1022_s6 }
  0x29   :  { %266 = vadd.xlane.f32.xlu0 %v152_v3  ;;  %v155_v11 = vmul.f32 %v1624_v9, %v1624_v9  ;;  %v1632_v13 = vld [vmem:[#allocation5 + $0x18] sm:$0xff]  ;;  %v138_v14 = vmul.f32 %v1630_v12, %v1630_v12  ;;  %v1640_v17 = vld [vmem:[#allocation5 + $0xa8] sm:$0xff]  ;;  %v156_v18 = vmul.f32 %v1638_v16, %v1638_v16  ;;  %v1646_v20 = vld [vmem:[#allocation5 + $0x20] sm:$0xff]  ;;  %s1524_s7 = scalar_lea.vmem %s1023_s6, 128  ;;  %p1529_p3 = scmp.lt.s32.totalorder %s1023_s6, %s1023_s6 }
  0x2a   :  { %234 = vadd.xlane.f32.xlu1 %v136_v4  ;;  %v139_v15 = vmul.f32 %v1632_v13, %v1632_v13  ;;  %v157_v19 = vmul.f32 %v1640_v17, %v1640_v17  ;;  %v1648_v21 = vld [vmem:[#allocation5 + $0x28] sm:$0xff]  ;;  %v140_v22 = vmul.f32 %v1646_v20, %v1646_v20  ;;  %v1654_v24 = vld [vmem:[#allocation5 + $0xb0] sm:$0xff]  ;;  %v1656_v25 = vld [vmem:[#allocation5 + $0xb8] sm:$0xff]  ;;  %p1525_p2 = scmp.ne.s32.totalorder %s1023_s6, %s1524_s7  ;;  %p1530_p4 = scmp.lt.s32.totalorder %s1524_s7, %s1524_s7 }
  0x2b   :  { %v141_v23 = vmul.f32 %v1648_v21, %v1648_v21  ;;  %v158_v26 = vmul.f32 %v1654_v24, %v1654_v24  ;;  %v159_v27 = vmul.f32 %v1656_v25, %v1656_v25  ;;  %v1662_v28 = vld [vmem:[#allocation5 + $0x30] sm:$0xff]  ;;  %v1664_v29 = vld [vmem:[#allocation5 + $0x38] sm:$0xff]  ;;  %v1670_v32 = vld [vmem:[#allocation5 + $0xc0] sm:$0xff] }
  0x2c   :  { %v142_v30 = vmul.f32 %v1662_v28, %v1662_v28  ;;  %v143_v31 = vmul.f32 %v1664_v29, %v1664_v29  ;;  %v1672_v33 = vld [vmem:[#allocation5 + $0xc8] sm:$0xff]  ;;  %v160_v34 = vmul.f32 %v1670_v32, %v1670_v32  ;;  %v1678_v36 = vld [vmem:[#allocation5 + $0x40] sm:$0xff]  ;;  %v1686_v40 = vld [vmem:[#allocation5 + $0xd0] sm:$0xff]  ;;  %p1531_p5 = por %p1530_p4, %p1529_p3 }
  0x2d   :  { %268 = vadd.xlane.f32.xlu0 %v153_v6  ;;  %v161_v35 = vmul.f32 %v1672_v33, %v1672_v33  ;;  %v1680_v37 = vld [vmem:[#allocation5 + $0x48] sm:$0xff]  ;;  %v144_v38 = vmul.f32 %v1678_v36, %v1678_v36  ;;  %v1688_v41 = vld [vmem:[#allocation5 + $0xd8] sm:$0xff]  ;;  %v162_v42 = vmul.f32 %v1686_v40, %v1686_v40  ;;  %v1694_v44 = vld [vmem:[#allocation5 + $0x50] sm:$0xff] }
  0x2e   :  { %236 = vadd.xlane.f32.xlu1 %v137_v7  ;;  %v145_v39 = vmul.f32 %v1680_v37, %v1680_v37  ;;  %v163_v43 = vmul.f32 %v1688_v41, %v1688_v41  ;;  %v1696_v45 = vld [vmem:[#allocation5 + $0x58] sm:$0xff]  ;;  %v146_v46 = vmul.f32 %v1694_v44, %v1694_v44  ;;  %v1702_v48 = vld [vmem:[#allocation5 + $0xe0] sm:$0xff]  ;;  %v1704_v49 = vld [vmem:[#allocation5 + $0xe8] sm:$0xff]  ;;  %p1532_p6 = pnand %p1531_p5, %p1525_p2 }
  0x2f   :  { %v147_v47 = vmul.f32 %v1696_v45, %v1696_v45  ;;  %v164_v50 = vmul.f32 %v1702_v48, %v1702_v48  ;;  %v165_v51 = vmul.f32 %v1704_v49, %v1704_v49  ;;  %v1710_v52 = vld [vmem:[#allocation5 + $0x60] sm:$0xff]  ;;  %v1712_v53 = vld [vmem:[#allocation5 + $0x68] sm:$0xff]  ;;  %v1718_v56 = vld [vmem:[#allocation5 + $0xf0] sm:$0xff] }
  0x30   :  { %v148_v54 = vmul.f32 %v1710_v52, %v1710_v52  ;;  %v149_v55 = vmul.f32 %v1712_v53, %v1712_v53  ;;  %v1720_v57 = vld [vmem:[#allocation5 + $0xf8] sm:$0xff]  ;;  %v166_v58 = vmul.f32 %v1718_v56, %v1718_v56  ;;  %v1726_v60 = vld [vmem:[#allocation5 + $0x70] sm:$0xff]  ;;  %v1734_v3 = vld [vmem:[#allocation5 + $0x180] sm:$0xff] }
  0x31   :  { %270 = vadd.xlane.f32.xlu0 %v154_v10  ;;  %v167_v59 = vmul.f32 %v1720_v57, %v1720_v57  ;;  %v1728_v61 = vld [vmem:[#allocation5 + $0x78] sm:$0xff]  ;;  %v150_v62 = vmul.f32 %v1726_v60, %v1726_v60  ;;  %v1736_v4 = vld [vmem:[#allocation5 + $0x188] sm:$0xff]  ;;  %v184_v6 = vmul.f32 %v1734_v3, %v1734_v3  ;;  %v1742_v10 = vld [vmem:[#allocation5 + $0x100] sm:$0xff] }
  0x32   :  { %272 = vadd.xlane.f32.xlu1 %v155_v11  ;;  %v151_v63 = vmul.f32 %v1728_v61, %v1728_v61  ;;  %v185_v7 = vmul.f32 %v1736_v4, %v1736_v4  ;;  %v1744_v11 = vld [vmem:[#allocation5 + $0x108] sm:$0xff] }
  0x35   :  { %238 = vadd.xlane.f32.xlu0 %v138_v14  ;;  %v168_v14 = vmul.f32 %v1742_v10, %v1742_v10 }
  0x36   :  { %240 = vadd.xlane.f32.xlu1 %v139_v15  ;;  %v169_v15 = vmul.f32 %v1744_v11, %v1744_v11 }
  0x39   :  { %274 = vadd.xlane.f32.xlu0 %v156_v18  ;;  %v1750_v18 = vld [vmem:[#allocation5 + $0x280] sm:$0xff] }
  0x3a   :  { %276 = vadd.xlane.f32.xlu1 %v157_v19  ;;  %v1752_v19 = vld [vmem:[#allocation5 + $0x288] sm:$0xff] }
  0x3d   :  { %242 = vadd.xlane.f32.xlu0 %v140_v22  ;;  %v216_v22 = vmul.f32 %v1750_v18, %v1750_v18 }
  0x3e   :  { %244 = vadd.xlane.f32.xlu1 %v141_v23  ;;  %v217_v23 = vmul.f32 %v1752_v19, %v1752_v19 }
  0x41   :  { %278 = vadd.xlane.f32.xlu0 %v158_v26  ;;  %v1758_v26 = vld [vmem:[#allocation5 + $0x200] sm:$0xff] }
  0x42   :  { %280 = vadd.xlane.f32.xlu1 %v159_v27  ;;  %v1760_v27 = vld [vmem:[#allocation5 + $0x208] sm:$0xff] }
  0x45   :  { %246 = vadd.xlane.f32.xlu0 %v142_v30  ;;  %v200_v30 = vmul.f32 %v1758_v26, %v1758_v26 }
  0x46   :  { %248 = vadd.xlane.f32.xlu1 %v143_v31  ;;  %v201_v31 = vmul.f32 %v1760_v27, %v1760_v27 }
  0x49   :  { %282 = vadd.xlane.f32.xlu0 %v160_v34  ;;  %v1766_v34 = vld [vmem:[#allocation5 + $0x190] sm:$0xff] }
  0x4a   :  { %284 = vadd.xlane.f32.xlu1 %v161_v35  ;;  %v1768_v35 = vld [vmem:[#allocation5 + $0x198] sm:$0xff] }
  0x4b   :  { %1988 = vst [vmem:[#allocation11_spill] sm:$0xff] %v1768_v35 }
  0x4d   :  { %250 = vadd.xlane.f32.xlu0 %v144_v38  ;;  %v186_v38 = vmul.f32 %v1766_v34, %v1766_v34 }
  0x4e   :  { %252 = vadd.xlane.f32.xlu1 %v145_v39  ;;  %v187_v39 = vmul.f32 %v1768_v35, %v1768_v35 }
  0x51   :  { %286 = vadd.xlane.f32.xlu0 %v162_v42  ;;  %v1774_v42 = vld [vmem:[#allocation5 + $0x110] sm:$0xff] }
  0x52   :  { %288 = vadd.xlane.f32.xlu1 %v163_v43  ;;  %1989 = vst [vmem:[#allocation12_spill] sm:$0xff] %v1774_v42  ;;  %v1776_v43 = vld [vmem:[#allocation5 + $0x118] sm:$0xff] }
  0x53   :  { %1990 = vst [vmem:[#allocation13_spill] sm:$0xff] %v1776_v43 }
  0x55   :  { %254 = vadd.xlane.f32.xlu0 %v146_v46  ;;  %v170_v46 = vmul.f32 %v1774_v42, %v1774_v42 }
  0x56   :  { %256 = vadd.xlane.f32.xlu1 %v147_v47  ;;  %v171_v47 = vmul.f32 %v1776_v43, %v1776_v43 }
  0x59   :  { %290 = vadd.xlane.f32.xlu0 %v164_v50  ;;  %v1782_v50 = vld [vmem:[#allocation5 + $0x290] sm:$0xff] }
  0x5a   :  { %292 = vadd.xlane.f32.xlu1 %v165_v51  ;;  %1991 = vst [vmem:[#allocation14_spill] sm:$0xff] %v1782_v50  ;;  %v1784_v51 = vld [vmem:[#allocation5 + $0x298] sm:$0xff] }
  0x5b   :  { %1992 = vst [vmem:[#allocation15_spill] sm:$0xff] %v1784_v51 }
  0x5d   :  { %258 = vadd.xlane.f32.xlu0 %v148_v54  ;;  %v218_v54 = vmul.f32 %v1782_v50, %v1782_v50 }
  0x5e   :  { %260 = vadd.xlane.f32.xlu1 %v149_v55  ;;  %v219_v55 = vmul.f32 %v1784_v51, %v1784_v51 }
  0x61   :  { %294 = vadd.xlane.f32.xlu0 %v166_v58  ;;  %v1790_v58 = vld [vmem:[#allocation5 + $0x210] sm:$0xff] }
  0x62   :  { %296 = vadd.xlane.f32.xlu1 %v167_v59  ;;  %1993 = vst [vmem:[#allocation16_spill] sm:$0xff] %v1790_v58  ;;  %v1792_v59 = vld [vmem:[#allocation5 + $0x218] sm:$0xff] }
  0x63   :  { %1994 = vst [vmem:[#allocation17_spill] sm:$0xff] %v1792_v59 }
  0x65   :  { %262 = vadd.xlane.f32.xlu0 %v150_v62  ;;  %v202_v62 = vmul.f32 %v1790_v58, %v1790_v58  ;;  %v81_v58 = vld [vmem:[#allocation5 + $0x158] sm:$0xff] }
  0x66   :  { %264 = vadd.xlane.f32.xlu1 %v151_v63  ;;  %v203_v63 = vmul.f32 %v1792_v59, %v1792_v59  ;;  %v80_v59 = vld [vmem:[#allocation5 + $0x150] sm:$0xff] }
  0x69   :  { %330 = vadd.xlane.f32.xlu0 %v184_v6  ;;  %v1798_v6 = vld [vmem:[#allocation5 + $0x1a0] sm:$0xff] }
  0x6a   :  { %332 = vadd.xlane.f32.xlu1 %v185_v7  ;;  %1995 = vst [vmem:[#allocation18_spill] sm:$0xff] %v1798_v6  ;;  %v1800_v7 = vld [vmem:[#allocation5 + $0x1a8] sm:$0xff] }
  0x6b   :  { %1996 = vst [vmem:[#allocation19_spill] sm:$0xff] %v1800_v7 }
  0x6d   :  { %298 = vadd.xlane.f32.xlu0 %v168_v14  ;;  %v188_v14 = vmul.f32 %v1798_v6, %v1798_v6  ;;  %v127_v6 = vld [vmem:[#allocation5 + $0x2c8] sm:$0xff] }
  0x6e   :  { %300 = vadd.xlane.f32.xlu1 %v169_v15  ;;  %v189_v15 = vmul.f32 %v1800_v7, %v1800_v7  ;;  %v126_v7 = vld [vmem:[#allocation5 + $0x2c0] sm:$0xff] }
  0x71   :  { %394 = vadd.xlane.f32.xlu0 %v216_v22  ;;  %v1806_v22 = vld [vmem:[#allocation5 + $0x120] sm:$0xff] }
  0x72   :  { %396 = vadd.xlane.f32.xlu1 %v217_v23  ;;  %1997 = vst [vmem:[#allocation20_spill] sm:$0xff] %v1806_v22  ;;  %v1808_v23 = vld [vmem:[#allocation5 + $0x128] sm:$0xff] }
  0x73   :  { %1998 = vst [vmem:[#allocation21_spill] sm:$0xff] %v1808_v23 }
  0x75   :  { %362 = vadd.xlane.f32.xlu0 %v200_v30  ;;  %v172_v30 = vmul.f32 %v1806_v22, %v1806_v22 }
  0x76   :  { %364 = vadd.xlane.f32.xlu1 %v201_v31  ;;  %v173_v31 = vmul.f32 %v1808_v23, %v1808_v23  ;;  %v78_v23 = vld [vmem:[#allocation5 + $0x140] sm:$0xff] }
  0x79   :  { %334 = vadd.xlane.f32.xlu0 %v186_v38  ;;  %v1814_v38 = vld [vmem:[#allocation5 + $0x2a0] sm:$0xff] }
  0x7a   :  { %336 = vadd.xlane.f32.xlu1 %v187_v39  ;;  %1999 = vst [vmem:[#allocation22_spill] sm:$0xff] %v1814_v38  ;;  %v1816_v39 = vld [vmem:[#allocation5 + $0x2a8] sm:$0xff] }
  0x7b   :  { %2000 = vst [vmem:[#allocation23_spill] sm:$0xff] %v1816_v39 }
  0x7d   :  { %302 = vadd.xlane.f32.xlu0 %v170_v46  ;;  %v220_v46 = vmul.f32 %v1814_v38, %v1814_v38  ;;  %v95_v38 = vld [vmem:[#allocation5 + $0x1c8] sm:$0xff] }
  0x7e   :  { %304 = vadd.xlane.f32.xlu1 %v171_v47  ;;  %v221_v47 = vmul.f32 %v1816_v39, %v1816_v39  ;;  %v94_v39 = vld [vmem:[#allocation5 + $0x1c0] sm:$0xff] }
  0x81   :  { %398 = vadd.xlane.f32.xlu0 %v218_v54  ;;  %v1822_v54 = vld [vmem:[#allocation5 + $0x220] sm:$0xff] }
  0x82   :  { %400 = vadd.xlane.f32.xlu1 %v219_v55  ;;  %2001 = vst [vmem:[#allocation24_spill] sm:$0xff] %v1822_v54  ;;  %v1824_v55 = vld [vmem:[#allocation5 + $0x228] sm:$0xff] }
  0x83   :  { %2002 = vst [vmem:[#allocation25_spill] sm:$0xff] %v1824_v55 }
  0x85   :  { %366 = vadd.xlane.f32.xlu0 %v202_v62  ;;  %v204_v62 = vmul.f32 %v1822_v54, %v1822_v54  ;;  %v1840_v54 = vld [vmem:[#allocation5 + $0x138] sm:$0xff] }
  0x86   :  { %368 = vadd.xlane.f32.xlu1 %v203_v63  ;;  %v205_v63 = vmul.f32 %v1824_v55, %v1824_v55  ;;  %2006 = vst [vmem:[#allocation29_spill] sm:$0xff] %v1840_v54 }
  0x89   :  { %338 = vadd.xlane.f32.xlu0 %v188_v14  ;;  %v1830_v14 = vld [vmem:[#allocation5 + $0x1b0] sm:$0xff] }
  0x8a   :  { %340 = vadd.xlane.f32.xlu1 %v189_v15  ;;  %2003 = vst [vmem:[#allocation26_spill] sm:$0xff] %v1830_v14  ;;  %v1832_v15 = vld [vmem:[#allocation5 + $0x1b8] sm:$0xff] }
  0x8b   :  { %2004 = vst [vmem:[#allocation27_spill] sm:$0xff] %v1832_v15 }
  0x8d   :  { %306 = vadd.xlane.f32.xlu0 %v172_v30  ;;  %v725_v30 = vld [vmem:[#allocation2 + $0x8] sm:$0xff] }
  0x8e   :  { %308 = vadd.xlane.f32.xlu1 %v173_v31  ;;  %799 = vmatprep.mubr.f32.mxu0 %v725_v30  ;;  %v190_v31 = vmul.f32 %v1830_v14, %v1830_v14  ;;  %v175_v30 = vmul.f32 %v1840_v54, %v1840_v54 }
  0x91   :  { %402 = vadd.xlane.f32.xlu0 %v220_v46  ;;  %v191_v46 = vmul.f32 %v1832_v15, %v1832_v15 }
  0x92   :  { %404 = vadd.xlane.f32.xlu1 %v221_v47  ;;  %v1838_v47 = vld [vmem:[#allocation5 + $0x130] sm:$0xff] }
  0x93   :  { %2005 = vst [vmem:[#allocation28_spill] sm:$0xff] %v1838_v47  ;;  %v174_v55 = vmul.f32 %v1838_v47, %v1838_v47 }
  0x95   :  { %370 = vadd.xlane.f32.xlu0 %v204_v62  ;;  %v1846_v62 = vld [vmem:[#allocation5 + $0x2b0] sm:$0xff] }
  0x96   :  { %372 = vadd.xlane.f32.xlu1 %v205_v63  ;;  %2007 = vst [vmem:[#allocation30_spill] sm:$0xff] %v1846_v62  ;;  %v1848_v63 = vld [vmem:[#allocation5 + $0x2b8] sm:$0xff]  ;;  %v222_v15 = vmul.f32 %v1846_v62, %v1846_v62  ;;  %v79_v62 = vld [vmem:[#allocation5 + $0x148] sm:$0xff] }
  0x97   :  { %2008 = vst [vmem:[#allocation31_spill] sm:$0xff] %v1848_v63  ;;  %v223_v14 = vmul.f32 %v1848_v63, %v1848_v63  ;;  %v176_v63 = vmul.f32 %v78_v23, %v78_v23  ;;  %v177_v22 = vmul.f32 %v79_v62, %v79_v62 }
  0x99   :  { %342 = vadd.xlane.f32.xlu0 %v190_v31  ;;  %v1854_v31 = vld [vmem:[#allocation5 + $0x230] sm:$0xff] }
  0x9a   :  { %344 = vadd.xlane.f32.xlu1 %v191_v46  ;;  %2009 = vst [vmem:[#allocation32_spill] sm:$0xff] %v1854_v31  ;;  %v109_v46 = vld [vmem:[#allocation5 + $0x238] sm:$0xff]  ;;  %v206_v54 = vmul.f32 %v1854_v31, %v1854_v31  ;;  %v110_v31 = vld [vmem:[#allocation5 + $0x240] sm:$0xff] }
  0x9b   :  { %v207_v47 = vmul.f32 %v109_v46, %v109_v46  ;;  %v111_v46 = vld [vmem:[#allocation5 + $0x248] sm:$0xff] }
  0x9d   :  { %310 = vadd.xlane.f32.xlu0 %v174_v55  ;;  %v192_v55 = vmul.f32 %v94_v39, %v94_v39  ;;  %v96_v39 = vld [vmem:[#allocation5 + $0x1d0] sm:$0xff] }
  0x9e   :  { %312 = vadd.xlane.f32.xlu1 %v175_v30  ;;  %v193_v30 = vmul.f32 %v95_v38, %v95_v38  ;;  %v97_v38 = vld [vmem:[#allocation5 + $0x1d8] sm:$0xff] }
  0xa1   :  { %406 = vadd.xlane.f32.xlu0 %v222_v15  ;;  %v225_v15 = vmul.f32 %v127_v6, %v127_v6  ;;  %v178_v6 = vmul.f32 %v80_v59, %v80_v59 }
  0xa2   :  { %408 = vadd.xlane.f32.xlu1 %v223_v14  ;;  %v224_v14 = vmul.f32 %v126_v7, %v126_v7  ;;  %v179_v7 = vmul.f32 %v81_v58, %v81_v58 }
  0xa5   :  { %374 = vadd.xlane.f32.xlu0 %v206_v54  ;;  %v208_v54 = vmul.f32 %v110_v31, %v110_v31  ;;  %v128_v31 = vld [vmem:[#allocation5 + $0x2d0] sm:$0xff] }
  0xa6   :  { %376 = vadd.xlane.f32.xlu1 %v207_v47  ;;  %v209_v47 = vmul.f32 %v111_v46, %v111_v46  ;;  %v129_v46 = vld [vmem:[#allocation5 + $0x2d8] sm:$0xff] }
  0xa9   :  { %346 = vadd.xlane.f32.xlu0 %v192_v55  ;;  %v194_v55 = vmul.f32 %v96_v39, %v96_v39  ;;  %v227_v39 = vmul.f32 %v129_v46, %v129_v46 }
  0xaa   :  { %348 = vadd.xlane.f32.xlu1 %v193_v30  ;;  %v195_v30 = vmul.f32 %v97_v38, %v97_v38 }
  0xad   :  { %314 = vadd.xlane.f32.xlu0 %v176_v63 }
  0xae   :  { %316 = vadd.xlane.f32.xlu1 %v177_v22 }
  0xb1   :  { %410 = vadd.xlane.f32.xlu0 %v224_v14 }
  0xb2   :  { %412 = vadd.xlane.f32.xlu1 %v225_v15 }
  0xb5   :  { %378 = vadd.xlane.f32.xlu0 %v208_v54 }
  0xb6   :  { %380 = vadd.xlane.f32.xlu1 %v209_v47  ;;  %v267_v23 = vpop.xlane.xlu0 %266  ;;  %v226_v47 = vmul.f32 %v128_v31, %v128_v31 }
  0xb7   :  { %v235_v62 = vpop.xlane.xlu1 %234  ;;  %v446_v63 = vmax.f32 %v267_v23, 1e-24 }
  0xb8   :  { %v430_v22 = vmax.f32 %v235_v62, 1e-24 }
  0xb9   :  { %350 = vadd.xlane.f32.xlu0 %v194_v55  ;;  %1255 = vrsqrt.f32 %v446_v63  ;;  %v112_v55 = vld [vmem:[#allocation5 + $0x250] sm:$0xff] }
  0xba   :  { %352 = vadd.xlane.f32.xlu1 %v195_v30  ;;  %v269_v14 = vpop.xlane.xlu0 %268  ;;  %1257 = vrsqrt.f32 %v430_v22  ;;  %v113_v30 = vld [vmem:[#allocation5 + $0x258] sm:$0xff]  ;;  %v210_v62 = vmul.f32 %v112_v55, %v112_v55  ;;  %v83_v55 = vld [vmem:[#allocation5 + $0x168] sm:$0xff] }
  0xbb   :  { %v237_v15 = vpop.xlane.xlu1 %236  ;;  %v447_v51 = vmax.f32 %v269_v14, 1e-24  ;;  %v211_v63 = vmul.f32 %v113_v30, %v113_v30 }
  0xbc   :  { %v431_v54 = vmax.f32 %v237_v15, 1e-24 }
  0xbd   :  { %1259 = vrsqrt.f32 %v447_v51  ;;  %318 = vadd.xlane.f32.xlu0 %v178_v6  ;;  %v98_v51 = vld [vmem:[#allocation5 + $0x1e0] sm:$0xff]  ;;  %v99_v6 = vld [vmem:[#allocation5 + $0x1e8] sm:$0xff] }
  0xbe   :  { %320 = vadd.xlane.f32.xlu1 %v179_v7  ;;  %1261 = vrsqrt.f32 %v431_v54  ;;  %v271_v38 = vpop.xlane.xlu0 %270  ;;  %v196_v46 = vmul.f32 %v98_v51, %v98_v51  ;;  %v197_v54 = vmul.f32 %v99_v6, %v99_v6 }
  0xbf   :  { %v273_v23 = vpop.xlane.xlu1 %272  ;;  %v448_v59 = vmax.f32 %v271_v38, 1e-24  ;;  %v82_v38 = vld [vmem:[#allocation5 + $0x160] sm:$0xff] }
  0xc0   :  { %v449_v58 = vmax.f32 %v273_v23, 1e-24 }
  0xc1   :  { %1263 = vrsqrt.f32 %v448_v59  ;;  %414 = vadd.xlane.f32.xlu0 %v226_v47 }
  0xc2   :  { %416 = vadd.xlane.f32.xlu1 %v227_v39  ;;  %1265 = vrsqrt.f32 %v449_v58  ;;  %v239_v14 = vpop.xlane.xlu0 %238 }
  0xc3   :  { %v241_v22 = vpop.xlane.xlu1 %240  ;;  %v432_v7 = vmax.f32 %v239_v14, 1e-24  ;;  %v1256_v31 = vpop.eup %1255 }
  0xc4   :  { %v433_v15 = vmax.f32 %v241_v22, 1e-24  ;;  %v1258_v23 = vpop.eup %1257  ;;  %v642_v43 = vmul.f32 %v1256_v31, %v1606_v0  ;;  %v180_v22 = vmul.f32 %v82_v38, %v82_v38  ;;  %v131_v31 = vld [vmem:[#allocation5 + $0x2e8] sm:$0xff]  ;;  %v114_v38 = vld [vmem:[#allocation5 + $0x260] sm:$0xff] }
  0xc5   :  { %1267 = vrsqrt.f32 %v432_v7  ;;  %382 = vadd.xlane.f32.xlu0 %v210_v62  ;;  %v181_v62 = vmul.f32 %v83_v55, %v83_v55 }
  0xc6   :  { %384 = vadd.xlane.f32.xlu1 %v211_v63  ;;  %1269 = vrsqrt.f32 %v433_v15  ;;  %v275_v47 = vpop.xlane.xlu0 %274  ;;  %v626_v63 = vmul.f32 %v1258_v23, %v1608_v1 }
  0xc7   :  { %v277_v39 = vpop.xlane.xlu1 %276  ;;  %v1260_v30 = vpop.eup %1259  ;;  %v450_v59 = vmax.f32 %v275_v47, 1e-24  ;;  %v130_v47 = vld [vmem:[#allocation5 + $0x2e0] sm:$0xff] }
  0xc8   :  { %v451_v58 = vmax.f32 %v277_v39, 1e-24  ;;  %v1262_v50 = vpop.eup %1261  ;;  %v643_v14 = vmul.f32 %v1260_v30, %v1610_v2 }
  0xc9   :  { %1271 = vrsqrt.f32 %v450_v59  ;;  %354 = vadd.xlane.f32.xlu0 %v196_v46  ;;  %v627_v51 = vmul.f32 %v1262_v50, %v1616_v5  ;;  %v228_v5 = vmul.f32 %v130_v47, %v130_v47  ;;  %v101_v47 = vld [vmem:[#allocation5 + $0x1f8] sm:$0xff] }
  0xca   :  { %356 = vadd.xlane.f32.xlu1 %v197_v54  ;;  %1273 = vrsqrt.f32 %v451_v58  ;;  %v243_v6 = vpop.xlane.xlu0 %242  ;;  %v1148_v15 = vpack.c.bf16 %v643_v14, %v642_v43  ;;  %v229_v54 = vmul.f32 %v131_v31, %v131_v31  ;;  %v115_v58 = vld [vmem:[#allocation5 + $0x268] sm:$0xff] }
  0xcb   :  { %v245_v7 = vpop.xlane.xlu1 %244  ;;  %v1264_v39 = vpop.eup %1263  ;;  %v434_v42 = vmax.f32 %v243_v6, 1e-24  ;;  %v1150_v0 = vpack.c.bf16 %v627_v51, %v626_v63  ;;  %v100_v63 = vld [vmem:[#allocation5 + $0x1f0] sm:$0xff] }
  0xcc   :  { %v435_v35 = vmax.f32 %v245_v7, 1e-24  ;;  %v1266_v2 = vpop.eup %1265  ;;  %1149 = vmatprep.subr.bf16.mxu0 %v1148_v15  ;;  %v644_v46 = vmul.f32 %v1264_v39, %v1622_v8 }
  0xcd   :  { %1275 = vrsqrt.f32 %v434_v42  ;;  %322 = vadd.xlane.f32.xlu0 %v180_v22  ;;  %v645_v1 = vmul.f32 %v1266_v2, %v1624_v9  ;;  %1151 = vmatpush3.bf16.msra.mxu0 %v1150_v0  ;;  %v212_v42 = vmul.f32 %v114_v38, %v114_v38  ;;  %v198_v0 = vmul.f32 %v100_v63, %v100_v63  ;;  %v85_v38 = vld [vmem:[#allocation5 + $0x178] sm:$0xff] }
  0xce   :  { %324 = vadd.xlane.f32.xlu1 %v181_v62  ;;  %1277 = vrsqrt.f32 %v435_v35  ;;  %v279_v50 = vpop.xlane.xlu0 %278  ;;  %v213_v62 = vmul.f32 %v115_v58, %v115_v58  ;;  %v183_v58 = vmul.f32 %v85_v38, %v85_v38 }
  0xcf   :  { %v281_v43 = vpop.xlane.xlu1 %280  ;;  %v1268_v23 = vpop.eup %1267  ;;  %v452_v55 = vmax.f32 %v279_v50, 1e-24  ;;  %v1152_v59 = vpack.c.bf16 %v645_v1, %v644_v46  ;;  %v199_v46 = vmul.f32 %v101_v47, %v101_v47  ;;  %v84_v1 = vld [vmem:[#allocation5 + $0x170] sm:$0xff] }
  0xd0   :  { %v453_v30 = vmax.f32 %v281_v43, 1e-24  ;;  %v1270_v14 = vpop.eup %1269  ;;  %v628_v8 = vmul.f32 %v1268_v23, %v1630_v12 }
  0xd1   :  { %1279 = vrsqrt.f32 %v452_v55  ;;  %1153 = vmatprep.subr.bf16.mxu0 %v1152_v59  ;;  %418 = vadd.xlane.f32.xlu0 %v228_v5  ;;  %v629_v9 = vmul.f32 %v1270_v14, %v1632_v13  ;;  %v182_v55 = vmul.f32 %v84_v1, %v84_v1  ;;  %v1870_v14 = vld [vmem:[#allocation5 + $0x2f0] sm:$0xff] }
  0xd2   :  { %1281 = vrsqrt.f32 %v453_v30  ;;  %420 = vadd.xlane.f32.xlu1 %v229_v54  ;;  %v247_v35 = vpop.xlane.xlu0 %246  ;;  %v230_v63 = vmul.f32 %v1870_v14, %v1870_v14 }
  0xd3   :  { %v249_v22 = vpop.xlane.xlu1 %248  ;;  %v1272_v51 = vpop.eup %1271  ;;  %v436_v6 = vmax.f32 %v247_v35, 1e-24  ;;  %v1154_v15 = vpack.c.bf16 %v629_v9, %v628_v8 }
  0xd4   :  { %v437_v7 = vmax.f32 %v249_v22, 1e-24  ;;  %v1274_v39 = vpop.eup %1273  ;;  %v646_v12 = vmul.f32 %v1272_v51, %v1638_v16  ;;  %v1872_v22 = vld [vmem:[#allocation5 + $0x2f8] sm:$0xff] }
  0xd5   :  { %1283 = vrsqrt.f32 %v436_v6  ;;  %1155 = vmatpush3.bf16.msra.mxu0 %v1154_v15  ;;  %386 = vadd.xlane.f32.xlu0 %v212_v42  ;;  %v647_v13 = vmul.f32 %v1274_v39, %v1640_v17  ;;  %v1880_v15 = vld [vmem:[#allocation5 + $0x270] sm:$0xff] }
  0xd6   :  { %1285 = vrsqrt.f32 %v437_v7  ;;  %388 = vadd.xlane.f32.xlu1 %v213_v62  ;;  %v283_v31 = vpop.xlane.xlu0 %282  ;;  %v231_v7 = vmul.f32 %v1872_v22, %v1872_v22 }
  0xd7   :  { %v285_v2 = vpop.xlane.xlu1 %284  ;;  %v1276_v5 = vpop.eup %1275  ;;  %v454_v50 = vmax.f32 %v283_v31, 1e-24  ;;  %v1156_v54 = vpack.c.bf16 %v647_v13, %v646_v12  ;;  %v1882_v13 = vld [vmem:[#allocation5 + $0x278] sm:$0xff] }
  0xd8   :  { %v455_v43 = vmax.f32 %v285_v2, 1e-24  ;;  %v1278_v23 = vpop.eup %1277  ;;  %v630_v16 = vmul.f32 %v1276_v5, %v1646_v20  ;;  %v214_v2 = vmul.f32 %v1880_v15, %v1880_v15  ;;  %v215_v5 = vmul.f32 %v1882_v13, %v1882_v13 }
  0xd9   :  { %1287 = vrsqrt.f32 %v454_v50  ;;  %1157 = vmatprep.subr.bf16.mxu0 %v1156_v54  ;;  %358 = vadd.xlane.f32.xlu0 %v198_v0  ;;  %v631_v17 = vmul.f32 %v1278_v23, %v1648_v21  ;;  %v1890_v50 = vld [vmem:[#allocation5 + $0x300] sm:$0xff]  ;;  %v1892_v23 = vld [vmem:[#allocation5 + $0x308] sm:$0xff] }
  0xda   :  { %1289 = vrsqrt.f32 %v455_v43  ;;  %360 = vadd.xlane.f32.xlu1 %v199_v46  ;;  %v251_v30 = vpop.xlane.xlu0 %250 }
  0xdb   :  { %v253_v59 = vpop.xlane.xlu1 %252  ;;  %v1280_v8 = vpop.eup %1279  ;;  %v438_v9 = vmax.f32 %v251_v30, 1e-24  ;;  %v1158_v35 = vpack.c.bf16 %v631_v17, %v630_v16 }
  0xdc   :  { %v439_v42 = vmax.f32 %v253_v59, 1e-24  ;;  %v1282_v20 = vpop.eup %1281  ;;  %v648_v62 = vmul.f32 %v1280_v8, %v1654_v24 }
  0xdd   :  { %1291 = vrsqrt.f32 %v438_v9  ;;  %1159 = vmatpush3.bf16.msra.mxu0 %v1158_v35  ;;  %326 = vadd.xlane.f32.xlu0 %v182_v55  ;;  %v649_v21 = vmul.f32 %v1282_v20, %v1656_v25  ;;  %v232_v55 = vmul.f32 %v1890_v50, %v1890_v50 }
  0xde   :  { %1293 = vrsqrt.f32 %v439_v42  ;;  %328 = vadd.xlane.f32.xlu1 %v183_v58  ;;  %v287_v51 = vpop.xlane.xlu0 %286  ;;  %v233_v58 = vmul.f32 %v1892_v23, %v1892_v23 }
  0xdf   :  { %v289_v6 = vpop.xlane.xlu1 %288  ;;  %v1284_v47 = vpop.eup %1283  ;;  %v456_v39 = vmax.f32 %v287_v51, 1e-24  ;;  %v1160_v12 = vpack.c.bf16 %v649_v21, %v648_v62 }
  0xe0   :  { %v457_v24 = vmax.f32 %v289_v6, 1e-24  ;;  %v1286_v0 = vpop.eup %1285  ;;  %v632_v25 = vmul.f32 %v1284_v47, %v1662_v28 }
  0xe1   :  { %1295 = vrsqrt.f32 %v456_v39  ;;  %1161 = vmatprep.subr.bf16.mxu0 %v1160_v12  ;;  %422 = vadd.xlane.f32.xlu0 %v230_v63  ;;  %v633_v31 = vmul.f32 %v1286_v0, %v1664_v29 }
  0xe2   :  { %1297 = vrsqrt.f32 %v457_v24  ;;  %424 = vadd.xlane.f32.xlu1 %v231_v7  ;;  %v255_v46 = vpop.xlane.xlu0 %254 }
  0xe3   :  { %v257_v1 = vpop.xlane.xlu1 %256  ;;  %v1288_v43 = vpop.eup %1287  ;;  %v440_v54 = vmax.f32 %v255_v46, 1e-24  ;;  %v1162_v38 = vpack.c.bf16 %v633_v31, %v632_v25 }
  0xe4   :  { %v441_v28 = vmax.f32 %v257_v1, 1e-24  ;;  %v1290_v16 = vpop.eup %1289  ;;  %v650_v29 = vmul.f32 %v1288_v43, %v1670_v32 }
  0xe5   :  { %1299 = vrsqrt.f32 %v440_v54  ;;  %1163 = vmatpush3.bf16.msra.mxu0 %v1162_v38  ;;  %390 = vadd.xlane.f32.xlu0 %v214_v2  ;;  %v651_v17 = vmul.f32 %v1290_v16, %v1672_v33 }
  0xe6   :  { %1301 = vrsqrt.f32 %v441_v28  ;;  %392 = vadd.xlane.f32.xlu1 %v215_v5  ;;  %v291_v30 = vpop.xlane.xlu0 %290 }
  0xe7   :  { %v293_v59 = vpop.xlane.xlu1 %292  ;;  %v1292_v8 = vpop.eup %1291  ;;  %v458_v9 = vmax.f32 %v291_v30, 1e-24  ;;  %v1164_v35 = vpack.c.bf16 %v651_v17, %v650_v29 }
  0xe8   :  { %v459_v42 = vmax.f32 %v293_v59, 1e-24  ;;  %v1294_v32 = vpop.eup %1293  ;;  %v634_v20 = vmul.f32 %v1292_v8, %v1678_v36 }
  0xe9   :  { %1303 = vrsqrt.f32 %v458_v9  ;;  %1165 = vmatprep.subr.bf16.mxu0 %v1164_v35  ;;  %426 = vadd.xlane.f32.xlu0 %v232_v55  ;;  %v635_v33 = vmul.f32 %v1294_v32, %v1680_v37 }
  0xea   :  { %1305 = vrsqrt.f32 %v459_v42  ;;  %428 = vadd.xlane.f32.xlu1 %v233_v58  ;;  %v259_v62 = vpop.xlane.xlu0 %258 }
  0xeb   :  { %v261_v21 = vpop.xlane.xlu1 %260  ;;  %v1296_v63 = vpop.eup %1295  ;;  %v442_v51 = vmax.f32 %v259_v62, 1e-24  ;;  %v1166_v7 = vpack.c.bf16 %v635_v33, %v634_v20 }
  0xec   :  { %v443_v6 = vmax.f32 %v261_v21, 1e-24  ;;  %v1298_v47 = vpop.eup %1297  ;;  %v652_v39 = vmul.f32 %v1296_v63, %v1686_v40  ;;  %v727_v63 = vld [vmem:[#allocation2 + $0x18] sm:$0xff] }
  0xed   :  { %1307 = vrsqrt.f32 %v442_v51  ;;  %1167 = vmatpush3.bf16.msra.mxu0 %v1166_v7  ;;  %v653_v36 = vmul.f32 %v1298_v47, %v1688_v41  ;;  %869 = vmatprep.mubr.f32.mxu1 %v727_v63 }
  0xee   :  { %1309 = vrsqrt.f32 %v443_v6  ;;  %v295_v24 = vpop.xlane.xlu0 %294 }
  0xef   :  { %v297_v12 = vpop.xlane.xlu1 %296  ;;  %v1300_v0 = vpop.eup %1299  ;;  %v460_v37 = vmax.f32 %v295_v24, 1e-24  ;;  %v1168_v31 = vpack.c.bf16 %v653_v36, %v652_v39 }
  0xf0   :  { %v461_v25 = vmax.f32 %v297_v12, 1e-24  ;;  %v1302_v2 = vpop.eup %1301  ;;  %v636_v46 = vmul.f32 %v1300_v0, %v1694_v44 }
  0xf1   :  { %1311 = vrsqrt.f32 %v460_v37  ;;  %1169 = vmatprep.subr.bf16.mxu0 %v1168_v31  ;;  %v637_v1 = vmul.f32 %v1302_v2, %v1696_v45 }
  0xf2   :  { %1313 = vrsqrt.f32 %v461_v25  ;;  %v263_v40 = vpop.xlane.xlu0 %262 }
  0xf3   :  { %v265_v5 = vpop.xlane.xlu1 %264  ;;  %v1304_v43 = vpop.eup %1303  ;;  %v444_v54 = vmax.f32 %v263_v40, 1e-24  ;;  %v1170_v28 = vpack.c.bf16 %v637_v1, %v636_v46  ;;  %v724_v1 = vld [vmem:[#allocation2] sm:$0xff] }
  0xf4   :  { %v445_v41 = vmax.f32 %v265_v5, 1e-24  ;;  %v1306_v38 = vpop.eup %1305  ;;  %v654_v16 = vmul.f32 %v1304_v43, %v1702_v48  ;;  %v729_v5 = vld [vmem:[#allocation2 + $0x28] sm:$0xff] }
  0xf5   :  { %1315 = vrsqrt.f32 %v444_v54  ;;  %1171 = vmatpush3.bf16.msra.mxu0 %v1170_v28  ;;  %v655_v29 = vmul.f32 %v1306_v38, %v1704_v49 }
  0xf6   :  { %1317 = vrsqrt.f32 %v445_v41  ;;  %v331_v44 = vpop.xlane.xlu0 %330 }
  0xf7   :  { %v333_v17 = vpop.xlane.xlu1 %332  ;;  %v1308_v55 = vpop.eup %1307  ;;  %v478_v30 = vmax.f32 %v331_v44, 1e-24  ;;  %v1172_v59 = vpack.c.bf16 %v655_v29, %v654_v16 }
  0xf8   :  { %v479_v45 = vmax.f32 %v333_v17, 1e-24  ;;  %v1310_v58 = vpop.eup %1309  ;;  %v638_v8 = vmul.f32 %v1308_v55, %v1710_v52 }
  0xf9   :  { %1319 = vrsqrt.f32 %v478_v30  ;;  %1173 = vmatprep.subr.bf16.mxu0 %v1172_v59  ;;  %v639_v9 = vmul.f32 %v1310_v58, %v1712_v53 }
  0xfa   :  { %1321 = vrsqrt.f32 %v479_v45  ;;  %v299_v48 = vpop.xlane.xlu0 %298 }
  0xfb   :  { %v301_v42 = vpop.xlane.xlu1 %300  ;;  %v1312_v35 = vpop.eup %1311  ;;  %v462_v32 = vmax.f32 %v299_v48, 1e-24  ;;  %v1174_v20 = vpack.c.bf16 %v639_v9, %v638_v8 }
  0xfc   :  { %v463_v49 = vmax.f32 %v301_v42, 1e-24  ;;  %v1314_v33 = vpop.eup %1313  ;;  %v656_v62 = vmul.f32 %v1312_v35, %v1718_v56 }
  0xfd   :  { %1323 = vrsqrt.f32 %v462_v32  ;;  %1175 = vmatpush3.bf16.msra.mxu0 %v1174_v20  ;;  %v657_v21 = vmul.f32 %v1314_v33, %v1720_v57 }
  0xfe   :  { %1325 = vrsqrt.f32 %v463_v49  ;;  %v395_v52 = vpop.xlane.xlu0 %394 }
  0xff   :  { %v397_v51 = vpop.xlane.xlu1 %396  ;;  %v1316_v53 = vpop.eup %1315  ;;  %v510_v6 = vmax.f32 %v395_v52, 1e-24  ;;  %v1176_v47 = vpack.c.bf16 %v657_v21, %v656_v62  ;;  %v2010_v52 = vld [vmem:[#allocation11_spill] sm:$0xff] }
 0x100   :  { %v511_v7 = vmax.f32 %v397_v51, 1e-24  ;;  %v1318_v39 = vpop.eup %1317  ;;  %v640_v36 = vmul.f32 %v1316_v53, %v1726_v60 }
 0x101   :  { %1327 = vrsqrt.f32 %v510_v6  ;;  %1177 = vmatprep.subr.bf16.mxu0 %v1176_v47  ;;  %v641_v56 = vmul.f32 %v1318_v39, %v1728_v61 }
 0x102   :  { %1329 = vrsqrt.f32 %v511_v7  ;;  %v363_v24 = vpop.xlane.xlu0 %362 }
 0x103   :  { %v365_v12 = vpop.xlane.xlu1 %364  ;;  %v1320_v57 = vpop.eup %1319  ;;  %v494_v0 = vmax.f32 %v363_v24, 1e-24  ;;  %v1178_v25 = vpack.c.bf16 %v641_v56, %v640_v36  ;;  %v2011_v36 = vld [vmem:[#allocation12_spill] sm:$0xff]  ;;  %v2012_v24 = vld [vmem:[#allocation13_spill] sm:$0xff] }
 0x104   :  { %v495_v37 = vmax.f32 %v365_v12, 1e-24  ;;  %v1322_v31 = vpop.eup %1321  ;;  %v674_v2 = vmul.f32 %v1320_v57, %v1734_v3 }
 0x105   :  { %1331 = vrsqrt.f32 %v494_v0  ;;  %1179 = vmatpush3.bf16.msra.mxu0 %v1178_v25  ;;  %v675_v46 = vmul.f32 %v1322_v31, %v1736_v4 }
 0x106   :  { %1333 = vrsqrt.f32 %v495_v37  ;;  %v335_v60 = vpop.xlane.xlu0 %334 }
 0x107   :  { %v337_v40 = vpop.xlane.xlu1 %336  ;;  %v1324_v61 = vpop.eup %1323  ;;  %v480_v43 = vmax.f32 %v335_v60, 1e-24  ;;  %v1180_v41 = vpack.c.bf16 %v675_v46, %v674_v2  ;;  %v2013_v46 = vld [vmem:[#allocation14_spill] sm:$0xff]  ;;  %v2014_v60 = vld [vmem:[#allocation15_spill] sm:$0xff] }
 0x108   :  { %v481_v54 = vmax.f32 %v337_v40, 1e-24  ;;  %v1326_v28 = vpop.eup %1325  ;;  %v658_v38 = vmul.f32 %v1324_v61, %v1742_v10  ;;  %800 = vmatmul.mubr.f32.vlgmr.msra.gmra.mrb[0].mxu0 %v724_v1 }
 0x109   :  { %1335 = vrsqrt.f32 %v480_v43  ;;  %1181 = vmatprep.subr.bf16.mxu1 %v1180_v41  ;;  %v659_v3 = vmul.f32 %v1326_v28, %v1744_v11  ;;  %939 = vmatprep.mubr.f32.mxu0 %v729_v5 }
 0x10a   :  { %1337 = vrsqrt.f32 %v481_v54  ;;  %v303_v4 = vpop.xlane.xlu0 %302 }
 0x10b   :  { %v305_v16 = vpop.xlane.xlu1 %304  ;;  %v1328_v29 = vpop.eup %1327  ;;  %v464_v44 = vmax.f32 %v303_v4, 1e-24  ;;  %v1182_v55 = vpack.c.bf16 %v659_v3, %v658_v38  ;;  %v2015_v3 = vld [vmem:[#allocation16_spill] sm:$0xff] }
 0x10c   :  { %v465_v17 = vmax.f32 %v305_v16, 1e-24  ;;  %v1330_v30 = vpop.eup %1329  ;;  %v706_v45 = vmul.f32 %v1328_v29, %v1750_v18  ;;  %v2016_v16 = vld [vmem:[#allocation17_spill] sm:$0xff] }
 0x10d   :  { %1339 = vrsqrt.f32 %v464_v44  ;;  %1183 = vmatpush3.bf16.msra.mxu1 %v1182_v55  ;;  %v707_v10 = vmul.f32 %v1330_v30, %v1752_v19 }
 0x10e   :  { %1341 = vrsqrt.f32 %v465_v17  ;;  %v399_v59 = vpop.xlane.xlu0 %398 }
 0x10f   :  { %v401_v58 = vpop.xlane.xlu1 %400  ;;  %v1332_v8 = vpop.eup %1331  ;;  %v512_v11 = vmax.f32 %v399_v59, 1e-24  ;;  %v1212_v48 = vpack.c.bf16 %v707_v10, %v706_v45 }
 0x110   :  { %v513_v9 = vmax.f32 %v401_v58, 1e-24  ;;  %v1334_v42 = vpop.eup %1333  ;;  %v690_v35 = vmul.f32 %v1332_v8, %v1758_v26  ;;  %v2017_v58 = vld [vmem:[#allocation18_spill] sm:$0xff] }
 0x111   :  { %1343 = vrsqrt.f32 %v512_v11  ;;  %1213 = vmatprep.subr.bf16.mxu0 %v1212_v48  ;;  %v691_v32 = vmul.f32 %v1334_v42, %v1760_v27  ;;  %v2018_v11 = vld [vmem:[#allocation19_spill] sm:$0xff] }
 0x112   :  { %1345 = vrsqrt.f32 %v513_v9  ;;  %v367_v18 = vpop.xlane.xlu0 %366 }
 0x113   :  { %v369_v49 = vpop.xlane.xlu1 %368  ;;  %v1336_v20 = vpop.eup %1335  ;;  %v496_v33 = vmax.f32 %v367_v18, 1e-24  ;;  %v1214_v62 = vpack.c.bf16 %v691_v32, %v690_v35 }
 0x114   :  { %v497_v19 = vmax.f32 %v369_v49, 1e-24  ;;  %v1338_v21 = vpop.eup %1337  ;;  %v676_v63 = vmul.f32 %v1336_v20, %v1766_v34 }
 0x115   :  { %1347 = vrsqrt.f32 %v496_v33  ;;  %1215 = vmatpush3.bf16.msra.mxu0 %v1214_v62  ;;  %v677_v51 = vmul.f32 %v1338_v21, %v2010_v52  ;;  %v2019_v33 = vld [vmem:[#allocation20_spill] sm:$0xff]  ;;  %v2020_v62 = vld [vmem:[#allocation21_spill] sm:$0xff] }
 0x116   :  { %1349 = vrsqrt.f32 %v497_v19  ;;  %v339_v26 = vpop.xlane.xlu0 %338 }
 0x117   :  { %v341_v53 = vpop.xlane.xlu1 %340  ;;  %v1340_v6 = vpop.eup %1339  ;;  %v482_v7 = vmax.f32 %v339_v26, 1e-24  ;;  %v1184_v47 = vpack.c.bf16 %v677_v51, %v676_v63 }
 0x118   :  { %v483_v27 = vmax.f32 %v341_v53, 1e-24  ;;  %v1342_v39 = vpop.eup %1341  ;;  %v660_v56 = vmul.f32 %v1340_v6, %v2011_v36 }
 0x119   :  { %1351 = vrsqrt.f32 %v482_v7  ;;  %1185 = vmatprep.subr.bf16.mxu1 %v1184_v47  ;;  %v661_v12 = vmul.f32 %v1342_v39, %v2012_v24  ;;  %v2022_v39 = vld [vmem:[#allocation23_spill] sm:$0xff] }
 0x11a   :  { %1353 = vrsqrt.f32 %v483_v27  ;;  %v307_v34 = vpop.xlane.xlu0 %306  ;;  %v2021_v27 = vld [vmem:[#allocation22_spill] sm:$0xff] }
 0x11b   :  { %v309_v57 = vpop.xlane.xlu1 %308  ;;  %v1344_v0 = vpop.eup %1343  ;;  %v466_v37 = vmax.f32 %v307_v34, 1e-24  ;;  %v1186_v31 = vpack.c.bf16 %v661_v12, %v660_v56 }
 0x11c   :  { %v467_v25 = vmax.f32 %v309_v57, 1e-24  ;;  %v1346_v2 = vpop.eup %1345  ;;  %v708_v1 = vmul.f32 %v1344_v0, %v2013_v46 }
 0x11d   :  { %1355 = vrsqrt.f32 %v466_v37  ;;  %1187 = vmatpush3.bf16.msra.mxu1 %v1186_v31  ;;  %v709_v40 = vmul.f32 %v1346_v2, %v2014_v60  ;;  %v2024_v2 = vld [vmem:[#allocation25_spill] sm:$0xff] }
 0x11e   :  { %1357 = vrsqrt.f32 %v467_v25  ;;  %v403_v5 = vpop.xlane.xlu0 %402  ;;  %v2023_v25 = vld [vmem:[#allocation24_spill] sm:$0xff] }
 0x11f   :  { %v405_v61 = vpop.xlane.xlu1 %404  ;;  %v1348_v43 = vpop.eup %1347  ;;  %v514_v54 = vmax.f32 %v403_v5, 1e-24  ;;  %v1216_v28 = vpack.c.bf16 %v709_v40, %v708_v1 }
 0x120   :  { %v515_v41 = vmax.f32 %v405_v61, 1e-24  ;;  %v1350_v38 = vpop.eup %1349  ;;  %v692_v4 = vmul.f32 %v1348_v43, %v2015_v3 }
 0x121   :  { %1359 = vrsqrt.f32 %v514_v54  ;;  %1217 = vmatprep.subr.bf16.mxu0 %v1216_v28  ;;  %v693_v29 = vmul.f32 %v1350_v38, %v2016_v16  ;;  %v2026_v38 = vld [vmem:[#allocation27_spill] sm:$0xff] }
 0x122   :  { %1361 = vrsqrt.f32 %v515_v41  ;;  %v371_v44 = vpop.xlane.xlu0 %370  ;;  %v2025_v41 = vld [vmem:[#allocation26_spill] sm:$0xff] }
 0x123   :  { %v373_v17 = vpop.xlane.xlu1 %372  ;;  %v1352_v55 = vpop.eup %1351  ;;  %v498_v30 = vmax.f32 %v371_v44, 1e-24  ;;  %v1218_v10 = vpack.c.bf16 %v693_v29, %v692_v4 }
 0x124   :  { %v499_v45 = vmax.f32 %v373_v17, 1e-24  ;;  %v1354_v59 = vpop.eup %1353  ;;  %v678_v8 = vmul.f32 %v1352_v55, %v2017_v58 }
 0x125   :  { %1363 = vrsqrt.f32 %v498_v30  ;;  %1219 = vmatpush3.bf16.msra.mxu0 %v1218_v10  ;;  %v679_v9 = vmul.f32 %v1354_v59, %v2018_v11  ;;  %v2028_v59 = vld [vmem:[#allocation29_spill] sm:$0xff] }
 0x126   :  { %1365 = vrsqrt.f32 %v499_v45  ;;  %v343_v48 = vpop.xlane.xlu0 %342  ;;  %v2027_v45 = vld [vmem:[#allocation28_spill] sm:$0xff] }
 0x127   :  { %v345_v42 = vpop.xlane.xlu1 %344  ;;  %v1356_v35 = vpop.eup %1355  ;;  %v484_v32 = vmax.f32 %v343_v48, 1e-24  ;;  %v1188_v49 = vpack.c.bf16 %v679_v9, %v678_v8 }
 0x128   :  { %v485_v18 = vmax.f32 %v345_v42, 1e-24  ;;  %v1358_v20 = vpop.eup %1357  ;;  %v662_v19 = vmul.f32 %v1356_v35, %v2019_v33 }
 0x129   :  { %1367 = vrsqrt.f32 %v484_v32  ;;  %1189 = vmatprep.subr.bf16.mxu1 %v1188_v49  ;;  %v663_v21 = vmul.f32 %v1358_v20, %v2020_v62  ;;  %v2030_v20 = vld [vmem:[#allocation31_spill] sm:$0xff] }
 0x12a   :  { %1369 = vrsqrt.f32 %v485_v18  ;;  %v311_v63 = vpop.xlane.xlu0 %310  ;;  %v2029_v18 = vld [vmem:[#allocation30_spill] sm:$0xff] }
 0x12b   :  { %v313_v52 = vpop.xlane.xlu1 %312  ;;  %v1360_v51 = vpop.eup %1359  ;;  %v468_v26 = vmax.f32 %v311_v63, 1e-24  ;;  %v1190_v6 = vpack.c.bf16 %v663_v21, %v662_v19 }
 0x12c   :  { %v469_v53 = vmax.f32 %v313_v52, 1e-24  ;;  %v1362_v7 = vpop.eup %1361  ;;  %v710_v47 = vmul.f32 %v1360_v51, %v2021_v27 }
 0x12d   :  { %1371 = vrsqrt.f32 %v468_v26  ;;  %1191 = vmatpush3.bf16.msra.mxu1 %v1190_v6  ;;  %v711_v36 = vmul.f32 %v1362_v7, %v2022_v39  ;;  %v1451_v7 = vld [vmem:[#allocation5 + $0x238] sm:$0xff] }
 0x12e   :  { %1373 = vrsqrt.f32 %v469_v53  ;;  %v407_v56 = vpop.xlane.xlu0 %406  ;;  %v2031_v53 = vld [vmem:[#allocation32_spill] sm:$0xff] }
 0x12f   :  { %v409_v24 = vpop.xlane.xlu1 %408  ;;  %v1364_v12 = vpop.eup %1363  ;;  %v516_v34 = vmax.f32 %v407_v56, 1e-24  ;;  %v1220_v0 = vpack.c.bf16 %v711_v36, %v710_v47 }
 0x130   :  { %v517_v57 = vmax.f32 %v409_v24, 1e-24  ;;  %v1366_v37 = vpop.eup %1365  ;;  %v694_v31 = vmul.f32 %v1364_v12, %v2023_v25 }
 0x131   :  { %1375 = vrsqrt.f32 %v516_v34  ;;  %1221 = vmatprep.subr.bf16.mxu0 %v1220_v0  ;;  %v695_v46 = vmul.f32 %v1366_v37, %v2024_v2  ;;  %v1453_v37 = vld [vmem:[#allocation5 + $0x1c8] sm:$0xff] }
 0x132   :  { %1377 = vrsqrt.f32 %v517_v57  ;;  %v375_v1 = vpop.xlane.xlu0 %374  ;;  %v1452_v57 = vld [vmem:[#allocation5 + $0x1c0] sm:$0xff] }
 0x133   :  { %v377_v60 = vpop.xlane.xlu1 %376  ;;  %v1368_v40 = vpop.eup %1367  ;;  %v500_v5 = vmax.f32 %v375_v1, 1e-24  ;;  %v1222_v43 = vpack.c.bf16 %v695_v46, %v694_v31 }
 0x134   :  { %v501_v61 = vmax.f32 %v377_v60, 1e-24  ;;  %v1370_v54 = vpop.eup %1369  ;;  %v680_v28 = vmul.f32 %v1368_v40, %v2025_v41 }
 0x135   :  { %1379 = vrsqrt.f32 %v500_v5  ;;  %1223 = vmatpush3.bf16.msra.mxu0 %v1222_v43  ;;  %v681_v3 = vmul.f32 %v1370_v54, %v2026_v38  ;;  %v1455_v54 = vld [vmem:[#allocation5 + $0x148] sm:$0xff] }
 0x136   :  { %1381 = vrsqrt.f32 %v501_v61  ;;  %v347_v4 = vpop.xlane.xlu0 %346  ;;  %v1454_v61 = vld [vmem:[#allocation5 + $0x140] sm:$0xff] }
 0x137   :  { %v349_v16 = vpop.xlane.xlu1 %348  ;;  %v1372_v29 = vpop.eup %1371  ;;  %v486_v44 = vmax.f32 %v347_v4, 1e-24  ;;  %v1192_v55 = vpack.c.bf16 %v681_v3, %v680_v28 }
 0x138   :  { %v487_v17 = vmax.f32 %v349_v16, 1e-24  ;;  %v1374_v30 = vpop.eup %1373  ;;  %v664_v10 = vmul.f32 %v1372_v29, %v2027_v45 }
 0x139   :  { %1383 = vrsqrt.f32 %v486_v44  ;;  %1193 = vmatprep.subr.bf16.mxu1 %v1192_v55  ;;  %v665_v58 = vmul.f32 %v1374_v30, %v2028_v59  ;;  %v1457_v30 = vld [vmem:[#allocation5 + $0x2c8] sm:$0xff] }
 0x13a   :  { %1385 = vrsqrt.f32 %v487_v17  ;;  %v315_v8 = vpop.xlane.xlu0 %314  ;;  %v1456_v17 = vld [vmem:[#allocation5 + $0x2c0] sm:$0xff] }
 0x13b   :  { %v317_v11 = vpop.xlane.xlu1 %316  ;;  %v1376_v9 = vpop.eup %1375  ;;  %v470_v48 = vmax.f32 %v315_v8, 1e-24  ;;  %v1194_v35 = vpack.c.bf16 %v665_v58, %v664_v10 }
 0x13c   :  { %v471_v42 = vmax.f32 %v317_v11, 1e-24  ;;  %v1378_v32 = vpop.eup %1377  ;;  %v712_v49 = vmul.f32 %v1376_v9, %v2029_v18 }
 0x13d   :  { %1387 = vrsqrt.f32 %v470_v48  ;;  %1195 = vmatpush3.bf16.msra.mxu1 %v1194_v35  ;;  %v713_v33 = vmul.f32 %v1378_v32, %v2030_v20  ;;  %v1459_v32 = vld [vmem:[#allocation5 + $0x248] sm:$0xff] }
 0x13e   :  { %1389 = vrsqrt.f32 %v471_v42  ;;  %v411_v19 = vpop.xlane.xlu0 %410  ;;  %v1458_v42 = vld [vmem:[#allocation5 + $0x240] sm:$0xff] }
 0x13f   :  { %v413_v62 = vpop.xlane.xlu1 %412  ;;  %v1380_v21 = vpop.eup %1379  ;;  %v518_v63 = vmax.f32 %v411_v19, 1e-24  ;;  %v1224_v51 = vpack.c.bf16 %v713_v33, %v712_v49 }
 0x140   :  { %v519_v52 = vmax.f32 %v413_v62, 1e-24  ;;  %v1382_v26 = vpop.eup %1381  ;;  %v696_v6 = vmul.f32 %v1380_v21, %v2031_v53 }
 0x141   :  { %1391 = vrsqrt.f32 %v518_v63  ;;  %1225 = vmatprep.subr.bf16.mxu0 %v1224_v51  ;;  %v697_v27 = vmul.f32 %v1451_v7, %v1382_v26  ;;  %v1461_v26 = vld [vmem:[#allocation5 + $0x1d8] sm:$0xff] }
 0x142   :  { %1393 = vrsqrt.f32 %v519_v52  ;;  %v379_v47 = vpop.xlane.xlu0 %378  ;;  %v1460_v52 = vld [vmem:[#allocation5 + $0x1d0] sm:$0xff] }
 0x143   :  { %v381_v39 = vpop.xlane.xlu1 %380  ;;  %v1384_v36 = vpop.eup %1383  ;;  %v502_v56 = vmax.f32 %v379_v47, 1e-24  ;;  %v1226_v12 = vpack.c.bf16 %v697_v27, %v696_v6 }
 0x144   :  { %v503_v24 = vmax.f32 %v381_v39, 1e-24  ;;  %v1386_v34 = vpop.eup %1385  ;;  %v682_v0 = vmul.f32 %v1452_v57, %v1384_v36 }
 0x145   :  { %1395 = vrsqrt.f32 %v502_v56  ;;  %1227 = vmatpush3.bf16.msra.mxu0 %v1226_v12  ;;  %v683_v25 = vmul.f32 %v1453_v37, %v1386_v34  ;;  %v1463_v34 = vld [vmem:[#allocation5 + $0x158] sm:$0xff] }
 0x146   :  { %1397 = vrsqrt.f32 %v503_v24  ;;  %v351_v31 = vpop.xlane.xlu0 %350  ;;  %v1462_v24 = vld [vmem:[#allocation5 + $0x150] sm:$0xff] }
 0x147   :  { %v353_v2 = vpop.xlane.xlu1 %352  ;;  %v1388_v46 = vpop.eup %1387  ;;  %v488_v1 = vmax.f32 %v351_v31, 1e-24  ;;  %v1196_v40 = vpack.c.bf16 %v683_v25, %v682_v0 }
 0x148   :  { %v489_v60 = vmax.f32 %v353_v2, 1e-24  ;;  %v1390_v5 = vpop.eup %1389  ;;  %v666_v43 = vmul.f32 %v1454_v61, %v1388_v46 }
 0x149   :  { %1399 = vrsqrt.f32 %v488_v1  ;;  %1197 = vmatprep.subr.bf16.mxu1 %v1196_v40  ;;  %v667_v41 = vmul.f32 %v1455_v54, %v1390_v5  ;;  %v1465_v5 = vld [vmem:[#allocation5 + $0x2d8] sm:$0xff] }
 0x14a   :  { %1401 = vrsqrt.f32 %v489_v60  ;;  %v319_v28 = vpop.xlane.xlu0 %318  ;;  %v1464_v60 = vld [vmem:[#allocation5 + $0x2d0] sm:$0xff] }
 0x14b   :  { %v321_v38 = vpop.xlane.xlu1 %320  ;;  %v1392_v3 = vpop.eup %1391  ;;  %v472_v4 = vmax.f32 %v319_v28, 1e-24  ;;  %v1198_v29 = vpack.c.bf16 %v667_v41, %v666_v43 }
 0x14c   :  { %v473_v16 = vmax.f32 %v321_v38, 1e-24  ;;  %v1394_v44 = vpop.eup %1393  ;;  %v714_v55 = vmul.f32 %v1456_v17, %v1392_v3 }
 0x14d   :  { %1403 = vrsqrt.f32 %v472_v4  ;;  %1199 = vmatpush3.bf16.msra.mxu1 %v1198_v29  ;;  %v715_v45 = vmul.f32 %v1457_v30, %v1394_v44  ;;  %v1467_v44 = vld [vmem:[#allocation5 + $0x258] sm:$0xff] }
 0x14e   :  { %1405 = vrsqrt.f32 %v473_v16  ;;  %v415_v10 = vpop.xlane.xlu0 %414  ;;  %v1466_v16 = vld [vmem:[#allocation5 + $0x250] sm:$0xff] }
 0x14f   :  { %v417_v59 = vpop.xlane.xlu1 %416  ;;  %v1396_v58 = vpop.eup %1395  ;;  %v520_v8 = vmax.f32 %v415_v10, 1e-24  ;;  %v1228_v9 = vpack.c.bf16 %v715_v45, %v714_v55 }
 0x150   :  { %v521_v11 = vmax.f32 %v417_v59, 1e-24  ;;  %v1398_v48 = vpop.eup %1397  ;;  %v698_v35 = vmul.f32 %v1458_v42, %v1396_v58 }
 0x151   :  { %1407 = vrsqrt.f32 %v520_v8  ;;  %1229 = vmatprep.subr.bf16.mxu0 %v1228_v9  ;;  %v699_v18 = vmul.f32 %v1459_v32, %v1398_v48  ;;  %v1469_v48 = vld [vmem:[#allocation5 + $0x1e8] sm:$0xff] }
 0x152   :  { %1409 = vrsqrt.f32 %v521_v11  ;;  %v383_v49 = vpop.xlane.xlu0 %382  ;;  %v1468_v11 = vld [vmem:[#allocation5 + $0x1e0] sm:$0xff] }
 0x153   :  { %v385_v20 = vpop.xlane.xlu1 %384  ;;  %v1400_v33 = vpop.eup %1399  ;;  %v504_v19 = vmax.f32 %v383_v49, 1e-24  ;;  %v1230_v21 = vpack.c.bf16 %v699_v18, %v698_v35 }
 0x154   :  { %v505_v62 = vmax.f32 %v385_v20, 1e-24  ;;  %v1402_v63 = vpop.eup %1401  ;;  %v684_v51 = vmul.f32 %v1460_v52, %v1400_v33 }
 0x155   :  { %1411 = vrsqrt.f32 %v504_v19  ;;  %1231 = vmatpush3.bf16.msra.mxu0 %v1230_v21  ;;  %v685_v53 = vmul.f32 %v1461_v26, %v1402_v63  ;;  %v1471_v63 = vld [vmem:[#allocation5 + $0x168] sm:$0xff] }
 0x156   :  { %1413 = vrsqrt.f32 %v505_v62  ;;  %v355_v6 = vpop.xlane.xlu0 %354  ;;  %v1470_v62 = vld [vmem:[#allocation5 + $0x160] sm:$0xff] }
 0x157   :  { %v357_v7 = vpop.xlane.xlu1 %356  ;;  %v1404_v27 = vpop.eup %1403  ;;  %v490_v47 = vmax.f32 %v355_v6, 1e-24  ;;  %v1200_v36 = vpack.c.bf16 %v685_v53, %v684_v51 }
 0x158   :  { %v491_v39 = vmax.f32 %v357_v7, 1e-24  ;;  %v1406_v56 = vpop.eup %1405  ;;  %v668_v12 = vmul.f32 %v1462_v24, %v1404_v27 }
 0x159   :  { %1415 = vrsqrt.f32 %v490_v47  ;;  %1201 = vmatprep.subr.bf16.mxu1 %v1200_v36  ;;  %v669_v57 = vmul.f32 %v1463_v34, %v1406_v56  ;;  %v1473_v56 = vld [vmem:[#allocation5 + $0x2e8] sm:$0xff] }
 0x15a   :  { %1417 = vrsqrt.f32 %v491_v39  ;;  %v323_v0 = vpop.xlane.xlu0 %322  ;;  %v1472_v39 = vld [vmem:[#allocation5 + $0x2e0] sm:$0xff] }
 0x15b   :  { %v325_v37 = vpop.xlane.xlu1 %324  ;;  %v1408_v25 = vpop.eup %1407  ;;  %v474_v31 = vmax.f32 %v323_v0, 1e-24  ;;  %v1202_v46 = vpack.c.bf16 %v669_v57, %v668_v12 }
 0x15c   :  { %v475_v2 = vmax.f32 %v325_v37, 1e-24  ;;  %v1410_v1 = vpop.eup %1409  ;;  %v716_v40 = vmul.f32 %v1464_v60, %v1408_v25 }
 0x15d   :  { %1419 = vrsqrt.f32 %v474_v31  ;;  %1203 = vmatpush3.bf16.msra.mxu1 %v1202_v46  ;;  %v717_v61 = vmul.f32 %v1465_v5, %v1410_v1  ;;  %v1475_v1 = vld [vmem:[#allocation5 + $0x268] sm:$0xff] }
 0x15e   :  { %1421 = vrsqrt.f32 %v475_v2  ;;  %v419_v43 = vpop.xlane.xlu0 %418  ;;  %v1474_v2 = vld [vmem:[#allocation5 + $0x260] sm:$0xff] }
 0x15f   :  { %v1412_v54 = vpop.eup %1411  ;;  %v522_v41 = vmax.f32 %v419_v43, 1e-24  ;;  %v421_v28 = vpop.xlane.xlu1 %420  ;;  %v1232_v38 = vpack.c.bf16 %v717_v61, %v716_v40 }
 0x160   :  { %v1414_v3 = vpop.eup %1413  ;;  %v523_v4 = vmax.f32 %v421_v28, 1e-24  ;;  %v700_v29 = vmul.f32 %v1466_v16, %v1412_v54 }
 0x161   :  { %1423 = vrsqrt.f32 %v522_v41  ;;  %1233 = vmatprep.subr.bf16.mxu0 %v1232_v38  ;;  %v701_v17 = vmul.f32 %v1467_v44, %v1414_v3  ;;  %v1476_v38 = vld [vmem:[#allocation5 + $0x1f0] sm:$0xff] }
 0x162   :  { %1425 = vrsqrt.f32 %v523_v4  ;;  %v387_v55 = vpop.xlane.xlu0 %386  ;;  %v1477_v4 = vld [vmem:[#allocation5 + $0x1f8] sm:$0xff] }
 0x163   :  { %v1416_v30 = vpop.eup %1415  ;;  %v506_v45 = vmax.f32 %v387_v55, 1e-24  ;;  %v389_v10 = vpop.xlane.xlu1 %388  ;;  %v1234_v59 = vpack.c.bf16 %v701_v17, %v700_v29 }
 0x164   :  { %v1418_v58 = vpop.eup %1417  ;;  %v507_v8 = vmax.f32 %v389_v10, 1e-24  ;;  %v686_v9 = vmul.f32 %v1468_v11, %v1416_v30 }
 0x165   :  { %1427 = vrsqrt.f32 %v506_v45  ;;  %1235 = vmatpush3.bf16.msra.mxu0 %v1234_v59  ;;  %v687_v42 = vmul.f32 %v1469_v48, %v1418_v58  ;;  %v1478_v59 = vld [vmem:[#allocation5 + $0x170] sm:$0xff] }
 0x166   :  { %1429 = vrsqrt.f32 %v507_v8  ;;  %v359_v35 = vpop.xlane.xlu0 %358  ;;  %v1479_v8 = vld [vmem:[#allocation5 + $0x178] sm:$0xff] }
 0x167   :  { %v1420_v32 = vpop.eup %1419  ;;  %v492_v18 = vmax.f32 %v359_v35, 1e-24  ;;  %v361_v49 = vpop.xlane.xlu1 %360  ;;  %v1204_v20 = vpack.c.bf16 %v687_v42, %v686_v9 }
 0x168   :  { %v1422_v33 = vpop.eup %1421  ;;  %v493_v19 = vmax.f32 %v361_v49, 1e-24  ;;  %v670_v21 = vmul.f32 %v1470_v62, %v1420_v32  ;;  %v726_v32 = vld [vmem:[#allocation2 + $0x10] sm:$0xff]  ;;  %v1556_v49 = vmov 0.0|0.0  }
 0x169   :  { %1431 = vrsqrt.f32 %v492_v18  ;;  %1205 = vmatprep.subr.bf16.mxu1 %v1204_v20  ;;  %v671_v52 = vmul.f32 %v1471_v63, %v1422_v33  ;;  %v1558_v63 = vmov 0.0  }
 0x16a   :  { %1433 = vrsqrt.f32 %v493_v19  ;;  %v327_v51 = vpop.xlane.xlu0 %326 }
 0x16b   :  { %v1424_v26 = vpop.eup %1423  ;;  %v476_v53 = vmax.f32 %v327_v51, 1e-24  ;;  %v329_v6 = vpop.xlane.xlu1 %328  ;;  %v1206_v7 = vpack.c.bf16 %v671_v52, %v670_v21 }
 0x16c   :  { %v1426_v27 = vpop.eup %1425  ;;  %v477_v47 = vmax.f32 %v329_v6, 1e-24  ;;  %v718_v36 = vmul.f32 %v1472_v39, %v1424_v26 }
 0x16d   :  { %1435 = vrsqrt.f32 %v476_v53  ;;  %1207 = vmatpush3.bf16.msra.mxu1 %v1206_v7  ;;  %v719_v24 = vmul.f32 %v1473_v56, %v1426_v27  ;;  %v730_v7 = vld [vmem:[#allocation2 + $0x30] sm:$0xff] }
 0x16e   :  { %1437 = vrsqrt.f32 %v477_v47  ;;  %v423_v12 = vpop.xlane.xlu0 %422 }
 0x16f   :  { %v1428_v34 = vpop.eup %1427  ;;  %v524_v57 = vmax.f32 %v423_v12, 1e-24  ;;  %v425_v0 = vpop.xlane.xlu1 %424  ;;  %v1236_v37 = vpack.c.bf16 %v719_v24, %v718_v36 }
 0x170   :  { %v1430_v25 = vpop.eup %1429  ;;  %v525_v31 = vmax.f32 %v425_v0, 1e-24  ;;  %v702_v46 = vmul.f32 %v1474_v2, %v1428_v34 }
 0x171   :  { %1439 = vrsqrt.f32 %v524_v57  ;;  %1237 = vmatprep.subr.bf16.mxu0 %v1236_v37  ;;  %v703_v60 = vmul.f32 %v1475_v1, %v1430_v25 }
 0x172   :  { %1441 = vrsqrt.f32 %v525_v31  ;;  %v391_v40 = vpop.xlane.xlu0 %390 }
 0x173   :  { %v1432_v5 = vpop.eup %1431  ;;  %v508_v61 = vmax.f32 %v391_v40, 1e-24  ;;  %v393_v43 = vpop.xlane.xlu1 %392  ;;  %v1238_v54 = vpack.c.bf16 %v703_v60, %v702_v46 }
 0x174   :  { %v1434_v41 = vpop.eup %1433  ;;  %v509_v28 = vmax.f32 %v393_v43, 1e-24  ;;  %v688_v3 = vmul.f32 %v1476_v38, %v1432_v5 }
 0x175   :  { %1443 = vrsqrt.f32 %v508_v61  ;;  %1239 = vmatpush3.bf16.msra.mxu0 %v1238_v54  ;;  %v689_v16 = vmul.f32 %v1477_v4, %v1434_v41 }
 0x176   :  { %1445 = vrsqrt.f32 %v509_v28  ;;  %v427_v29 = vpop.xlane.xlu0 %426 }
 0x177   :  { %v1436_v44 = vpop.eup %1435  ;;  %v526_v17 = vmax.f32 %v427_v29, 1e-24  ;;  %v429_v55 = vpop.xlane.xlu1 %428  ;;  %v1208_v30 = vpack.c.bf16 %v689_v16, %v688_v3 }
 0x178   :  { %v1438_v45 = vpop.eup %1437  ;;  %v527_v10 = vmax.f32 %v429_v55, 1e-24  ;;  %v672_v58 = vmul.f32 %v1478_v59, %v1436_v44 }
 0x179   :  { %1447 = vrsqrt.f32 %v526_v17  ;;  %1209 = vmatprep.subr.bf16.mxu1 %v1208_v30  ;;  %v673_v11 = vmul.f32 %v1479_v8, %v1438_v45 }
 0x17a   :  { %1449 = vrsqrt.f32 %v527_v10 }
 0x17b   :  { %v1440_v9 = vpop.eup %1439  ;;  %v1210_v48 = vpack.c.bf16 %v673_v11, %v672_v58 }
 0x17c   :  { %v1442_v42 = vpop.eup %1441  ;;  %v720_v35 = vmul.f32 %v1440_v9, %v1870_v14 }
 0x17d   :  { %1211 = vmatpush3.bf16.msra.mxu1 %v1210_v48  ;;  %v721_v18 = vmul.f32 %v1442_v42, %v1872_v22  ;;  %v728_v22 = vld [vmem:[#allocation2 + $0x20] sm:$0xff] }
 0x17e   :  { %1244 = vmatprep.subr.bf16.mxu1 %v1556_v49 }
 0x17f   :  { %v1444_v20 = vpop.eup %1443  ;;  %v1240_v33 = vpack.c.bf16 %v721_v18, %v720_v35 }
 0x180   :  { %v1446_v19 = vpop.eup %1445  ;;  %870 = vmatmul.mubr.f32.vlgmr.msra.gmra.mrb[0].mxu1 %v726_v32  ;;  %v704_v62 = vmul.f32 %v1444_v20, %v1880_v15 }
 0x181   :  { %1241 = vmatprep.subr.bf16.mxu0 %v1240_v33  ;;  %v705_v21 = vmul.f32 %v1446_v19, %v1882_v13  ;;  %1145 = vmatprep.mubr.msk.f32.mxu1 %vm1557_vm0, %v1558_v63 }
 0x183   :  { %v1448_v52 = vpop.eup %1447  ;;  %v1242_v14 = vpack.c.bf16 %v705_v21, %v704_v62 }
 0x184   :  { %v1450_v51 = vpop.eup %1449  ;;  %v722_v26 = vmul.f32 %v1448_v52, %v1890_v50 }
 0x185   :  { %1243 = vmatpush3.bf16.msra.mxu0 %v1242_v14  ;;  %v723_v53 = vmul.f32 %v1450_v51, %v1892_v23 }
 0x187   :  { %v1245_v6 = vpack.c.bf16 %v723_v53, %v722_v26 }
 0x188   :  { %940 = vmatmul.mubr.f32.vlgmr.msra.gmra.mrb[2].mxu0 %v728_v22 }
 0x189   :  { %1246 = vmatpush3.bf16.msra.mxu1 %v1245_v6 }
 0x18c   :  { %1146 = vmatmul.mubr.msk.f32.vlgmr.msra.gmra.mrb[2].mxu1 %vm731_vm1, %v730_v7 }
 0x1db   :  { %v1065_v15 = vpop.f32.mrb[0].mxu0 }
 0x1dc   :  { %v1066_v13 = vpop.f32.mrb[1].mxu0 }
 0x1dd   :  { %v1067_v27 = vadd.f32 %v1066_v13, %v1065_v15 }
 0x253   :  { %v1100_v47 = vpop.f32.mrb[0].mxu1 }
 0x254   :  { %v1101_v39 = vpop.f32.mrb[1].mxu1 }
 0x255   :  { %v1102_v36 = vadd.f32 %v1101_v39, %v1100_v47 }
 0x257   :  { %v872_v56 = vadd.f32 %v1102_v36, %v1067_v27 }
 0x25b   :  { %v1135_v24 = vpop.f32.mrb[2].mxu0 }
 0x25c   :  { %v1136_v12 = vpop.f32.mrb[3].mxu0 }
 0x25d   :  { %v1137_v50 = vadd.f32 %v1136_v12, %v1135_v24 }
 0x25f   :  { %v942_v34 = vadd.f32 %v1137_v50, %v872_v56  ;;  %v1011_v23 = vpop.f32.mrb[2].mxu1 }
 0x260   :  { %v1147_v57 = vpop.f32.mrb[3].mxu1 }
 0x261   :  { %v1012_v0 = vadd.f32 %v1011_v23, %v942_v34 }
 0x263   :  { %1015 = vst [vmem:[#allocation7] sm:$0xff] %v1012_v0 }
 0x264   :  { %1535 = shalt.err (!%p1532_p6)
}
 0x265   :  { %s1536_s10 = scalar_lea.hbm %s1965_s2, 128 }
 0x266   :  { %p1537_p7 = scmp.ne.s32.totalorder %s1965_s2, %s1536_s10  ;;  %p1540_p8 = scmp.lt.u32.totalorder %s1536_s10, %s1965_s2 }
 0x268   :  { %p1542_p9 = pnand %p1540_p8, %p1537_p7 }
 0x26a   :  { %1545 = shalt.err (!%p1542_p9)
}
 0x26b   :  { %1025 = dma.vmem_to_hbm [thread:$0]  %s1023_s6, 128, %s1965_s2, [#allocation4]  }
 0x26c   :  { %1550 = dma.done.wait [#allocation4], 128  }
 0x26d   :  { %1551 = vsyncadd [#allocation4], 4294967168 }
 0x26e   :  { %1029 = vsyncpa [#allocation3], 1 }
 0x26f   :  { %1030 = vsyncpa [#allocation6], 1 }
 0x270   :  { %1031 = vsyncpa [#allocation4], 1 }

</bundles_post_ra>
